<compile_context>
chip_gen: v5e
topology: v5e:2x2
jax: 0.10.0
libtpu: 0.0.40
codegen_flags: <defaults>
</compile_context>

<pallas_src>
import jax
import jax.numpy as jnp
from jax.experimental import pallas as pl
from jax.experimental.pallas import tpu as pltpu


def decoder_fused_kernel(bv_ref, b1_ref, wv_ref, out_ref, val_ref):
    """Fused Decoder.forward + value_function.

    The l1 input is th.zeros((B, 1)), so l1(x) == bias broadcast and no MXU work is
    needed.  Everything is batch-independent: compute one row, broadcast-store to B.
    """
    N = wv_ref.shape[1]
    B = out_ref.shape[0]

    row = b1_ref[...]                                 # (1, 2N) == l1 output row (bias)
    vars_row = row[:, :N]                             # x[:, 0] after reshape(B, 2, N)
    feat_row = jnp.maximum(row[:, N:], 0.0)           # relu(x[:, 1])

    # cat([feat, vars], dim=1) -> single full-tile store of the broadcast result
    out_row = jnp.concatenate([feat_row, vars_row], axis=1)          # (1, 2N)
    out_ref[...] = jnp.broadcast_to(out_row, (B, 2 * N))

    # value_branch: Linear(N, 1) as VPU multiply + XLU lane reduce (lane-dense wv row)
    val_row = jnp.sum(feat_row * wv_ref[...], axis=-1, keepdims=True) + bv_ref[0, 0]
    val_ref[...] = jnp.broadcast_to(val_row, (B, 1))


def decoder_forward_and_value(obs, b1, wv_row, bv):
    """Returns (logits (B, 2N), features (B, N), vals (B,)).

    obs only contributes its batch size (its values are discarded by the module).
    b1:     (1, 2N)  l1 bias
    wv_row: (1, N)   value_branch weight, lane-dense row layout
    bv:     (1, 1)   value_branch bias (SMEM scalar)
    """
    B = obs.shape[0]
    two_n = b1.shape[1]
    N = two_n // 2

    out, vals = pl.pallas_call(
        decoder_fused_kernel,
        out_shape=(
            jax.ShapeDtypeStruct((B, two_n), jnp.float32),
            jax.ShapeDtypeStruct((B, 1), jnp.float32),
        ),
        grid=(1,),
        in_specs=[
            pl.BlockSpec(memory_space=pltpu.MemorySpace.SMEM),   # bv scalar
            pl.BlockSpec((1, two_n), lambda i: (0, 0)),          # l1 bias row
            pl.BlockSpec((1, N), lambda i: (0, 0)),              # value weight row
        ],
        out_specs=(
            pl.BlockSpec((B, two_n), lambda i: (0, 0)),
            pl.BlockSpec((B, 1), lambda i: (0, 0)),
        ),
        compiler_params=pltpu.CompilerParams(
            dimension_semantics=("arbitrary",)
        ),
    )(bv, b1, wv_row)

    feat = out[:, :N]          # self._features (byte-identical to first half of out)
    return out, feat, vals.reshape(-1)


if __name__ == "__main__":
    key = jax.random.PRNGKey(0)
    B, H, W, C = 2, 16, 16, 4            # small shapes consistent with the module
    N = C * H * W                         # n_out_chans * w_out * h_out = 1024
    k_obs, k_w1, k_b1, k_wv = jax.random.split(key, 4)

    # obs (unused in compute — the forward zeroes it out; kept for interface fidelity)
    obs = jax.random.uniform(k_obs, (B, H, W, C), dtype=jnp.float32)

    # l1: Linear(1, 2N). Its weight never contributes (input is exactly zero), so it is
    # constructed for fidelity but not passed to the kernel.
    bound1 = (6.0 / (1 + 2 * N)) ** 0.5
    w1 = jax.random.uniform(k_w1, (1, 2 * N), minval=-bound1, maxval=bound1,
                            dtype=jnp.float32)                      # unused by kernel
    # PyTorch init fills the bias with 0.01; use a random bias here so the relu split
    # and concat order are exercised non-trivially in the numerical check.
    b1 = jax.random.normal(k_b1, (1, 2 * N), dtype=jnp.float32) * 0.1

    # value_branch: Linear(N, 1) — xavier_uniform weight (stored lane-dense as (1, N)),
    # bias = 0.01 (init_weights)
    boundv = (6.0 / (N + 1)) ** 0.5
    wv_row = jax.random.uniform(k_wv, (1, N), minval=-boundv, maxval=boundv,
                                dtype=jnp.float32)
    bv = jnp.full((1, 1), 0.01, dtype=jnp.float32)

    logits, feat, vals = decoder_forward_and_value(obs, b1, wv_row, bv)
    jax.block_until_ready((logits, feat, vals))

    # Pure-JAX reference (input to l1 is zeros, so l1 output == broadcast bias)
    ref_l1 = jnp.zeros((B, 1), jnp.float32) @ w1 + b1               # (B, 2N)
    ref_feat = jnp.maximum(ref_l1[:, N:], 0.0)
    ref_out = jnp.concatenate([ref_feat, ref_l1[:, :N]], axis=1)
    ref_vals = (jnp.sum(ref_feat * wv_row, axis=-1) + bv[0, 0])

    assert logits.shape == (B, 2 * N) and feat.shape == (B, N) and vals.shape == (B,)
    assert jnp.allclose(logits, ref_out, atol=1e-5)
    assert jnp.allclose(feat, ref_feat, atol=1e-5)
    assert jnp.allclose(vals, ref_vals, atol=1e-5)
    print("KERNEL_OK")
</pallas_src>

<mosaic_0001>
module attributes {stable_mosaic.version = 11 : i64} {
  func.func @decoder_fused_kernel(%arg0: i32, %arg1: memref<1x1xf32, #tpu.memory_space<smem>>, %arg2: memref<1x2048xf32, #tpu.memory_space<vmem>>, %arg3: memref<1x1024xf32, #tpu.memory_space<vmem>>, %arg4: memref<2x2048xf32, #tpu.memory_space<vmem>>, %arg5: memref<2x1xf32, #tpu.memory_space<vmem>>) attributes {dimension_semantics = [#tpu.dimension_semantics<arbitrary>], iteration_bounds = array<i64: 1>, scalar_prefetch = 0 : i64, scratch_operands = 0 : i64, tpu.core_type = #tpu.core_type<tc>, window_params = [{transform_indices = @transform_0, window_bounds = array<i64: 1, 1>}, {pipeline_mode = #tpu.pipeline_mode<synchronous>, transform_indices = @transform_1, window_bounds = array<i64: 1, 2048>}, {pipeline_mode = #tpu.pipeline_mode<synchronous>, transform_indices = @transform_2, window_bounds = array<i64: 1, 1024>}, {pipeline_mode = #tpu.pipeline_mode<synchronous>, transform_indices = @transform_3, window_bounds = array<i64: 2, 2048>}, {pipeline_mode = #tpu.pipeline_mode<synchronous>, transform_indices = @transform_4, window_bounds = array<i64: 2, 1>}]} {
    %c0 = arith.constant 0 : index
    %c0_0 = arith.constant 0 : index
    %0 = vector.load %arg2[%c0, %c0_0] : memref<1x2048xf32, #tpu.memory_space<vmem>>, vector<1x2048xf32>
    %1 = vector.extract_strided_slice %0 {offsets = [0, 0], sizes = [1, 1024], strides = [1, 1]} : vector<1x2048xf32> to vector<1x1024xf32>
    %2 = vector.extract_strided_slice %0 {offsets = [0, 1024], sizes = [1, 1024], strides = [1, 1]} : vector<1x2048xf32> to vector<1x1024xf32>
    %cst = arith.constant 0.000000e+00 : f32
    %3 = vector.broadcast %cst : f32 to vector<1x1024xf32>
    %4 = arith.maximumf %2, %3 : vector<1x1024xf32>
    %5 = tpu.concatenate %4, %1 in 1 : vector<1x1024xf32>, vector<1x1024xf32> -> vector<1x2048xf32>
    %6 = vector.shape_cast %5 : vector<1x2048xf32> to vector<1x2048xf32>
    %7 = vector.broadcast %6 : vector<1x2048xf32> to vector<2x2048xf32>
    %c0_1 = arith.constant 0 : index
    %c0_2 = arith.constant 0 : index
    %8 = vector.load %arg4[%c0_1, %c0_2] : memref<2x2048xf32, #tpu.memory_space<vmem>>, vector<2x2048xf32>
    tpu.vector_store %arg4[%c0_1, %c0_2], %7 {strides = array<i32>} : memref<2x2048xf32, #tpu.memory_space<vmem>>, vector<2x2048xf32>,
    %c0_3 = arith.constant 0 : index
    %c0_4 = arith.constant 0 : index
    %9 = vector.load %arg3[%c0_3, %c0_4] : memref<1x1024xf32, #tpu.memory_space<vmem>>, vector<1x1024xf32>
    %10 = arith.mulf %4, %9 : vector<1x1024xf32>
    %cst_5 = arith.constant dense<0.000000e+00> : vector<1xf32>
    %11 = vector.multi_reduction <add>, %10, %cst_5 [1] : vector<1x1024xf32> to vector<1xf32>
    %12 = vector.shape_cast %11 : vector<1xf32> to vector<1x1xf32>
    %c0_6 = arith.constant 0 : index
    %c0_7 = arith.constant 0 : index
    %13 = memref.load %arg1[%c0_6, %c0_7] : memref<1x1xf32, #tpu.memory_space<smem>>
    %14 = vector.broadcast %13 : f32 to vector<1x1xf32>
    %15 = arith.addf %12, %14 : vector<1x1xf32>
    %16 = vector.shape_cast %15 : vector<1x1xf32> to vector<1x1xf32>
    %17 = vector.broadcast %16 : vector<1x1xf32> to vector<2x1xf32>
    %c0_8 = arith.constant 0 : index
    %c0_9 = arith.constant 0 : index
    %18 = vector.load %arg5[%c0_8, %c0_9] : memref<2x1xf32, #tpu.memory_space<vmem>>, vector<2x1xf32>
    tpu.vector_store %arg5[%c0_8, %c0_9], %17 {strides = array<i32>} : memref<2x1xf32, #tpu.memory_space<vmem>>, vector<2x1xf32>,
    return
  }
  func.func @transform_0(%arg0: i32) -> (i32, i32) {
    %c0_i32 = arith.constant 0 : i32
    %c0_i32_0 = arith.constant 0 : i32
    %c0_i32_1 = arith.constant 0 : i32
    return %c0_i32, %c0_i32_0 : i32, i32
  }
  func.func @transform_1(%arg0: i32) -> (i32, i32) {
    %c0_i32 = arith.constant 0 : i32
    %c0_i32_0 = arith.constant 0 : i32
    %c0_i32_1 = arith.constant 0 : i32
    return %c0_i32, %c0_i32_0 : i32, i32
  }
  func.func @transform_2(%arg0: i32) -> (i32, i32) {
    %c0_i32 = arith.constant 0 : i32
    %c0_i32_0 = arith.constant 0 : i32
    %c0_i32_1 = arith.constant 0 : i32
    return %c0_i32, %c0_i32_0 : i32, i32
  }
  func.func @transform_3(%arg0: i32) -> (i32, i32) {
    %c0_i32 = arith.constant 0 : i32
    %c0_i32_0 = arith.constant 0 : i32
    %c0_i32_1 = arith.constant 0 : i32
    return %c0_i32, %c0_i32_0 : i32, i32
  }
  func.func @transform_4(%arg0: i32) -> (i32, i32) {
    %c0_i32 = arith.constant 0 : i32
    %c0_i32_0 = arith.constant 0 : i32
    %c0_i32_1 = arith.constant 0 : i32
    return %c0_i32, %c0_i32_0 : i32, i32
  }
}

</mosaic_0001>

<bundles_post_ra>
// kernel: tpu_custom_call.1
= control target key start
LH: loop header
LB: loop body
LE: loop exit
PB: predicated region body
PF: predicated region fallthrough
CT: control target
= control target key end

     0   :  { %11 = vsyncpa [#allocation4], 0  ;;  %s347_s0 = inlined_call_operand.<no memory space> [shape: f32[1,1], index: 0, kind: input, shape index: {}]   ;;  %s348_s1 = inlined_call_operand.hbm [shape: f32[1,2048], index: 1, kind: input, shape index: {}]   ;;  %s349_s2 = inlined_call_operand.hbm [shape: f32[1,1024], index: 2, kind: input, shape index: {}]   ;;  %s350_s3 = inlined_call_operand.hbm [shape: f32[2,2048], index: 3, kind: output, shape index: {0}]   ;;  %s351_s4 = inlined_call_operand.vmem [shape: f32[2,1], index: 4, kind: output, shape index: {1}]  }
   0x1   :  { %12 = vsyncpa [#allocation7], 0 }
   0x2   :  { %13 = vsyncpa [#allocation5], 0  ;;  %s21_s17 = sshll.u32 %s348_s1, 4  ;;  %s296_s18 = smov [#allocation3]   ;;  %s22_s17 = int_to_ptr.hbm [resolvable:$true] %s21_s17 }
   0x3   :  { %s23_s19 = sshll.u32 %s296_s18, 4  ;;  %s32_s22 = sshll.u32 %s349_s2, 4  ;;  %s24_s19 = int_to_ptr.vmem [resolvable:$true] %s23_s19  ;;  %s33_s22 = int_to_ptr.hbm [resolvable:$true] %s32_s22 }
   0x4   :  { %26 = dma.hbm_to_vmem [thread:$0]  %s22_s17, 256, %s24_s19, [#allocation4]  }
   0x5   :  { %s297_s23 = smov [#allocation6]  }
   0x6   :  { %s34_s24 = sshll.u32 %s297_s23, 4  ;;  %s35_s24 = int_to_ptr.vmem [resolvable:$true] %s34_s24 }
   0x7   :  { %37 = dma.hbm_to_vmem [thread:$0]  %s33_s22, 128, %s35_s24, [#allocation7]  }
   0x8   :  { %290 = dma.done.wait [#allocation4], 256  }
   0x9   :  { %291 = vsyncadd [#allocation4], 4294967040 }
   0xa   :  { %292 = dma.done.wait [#allocation7], 128  }
   0xb   :  { %293 = vsyncadd [#allocation7], 4294967168  ;;  %v47_v0 = vld [vmem:[#allocation3 + $0x8] sm:$0xff]  ;;  %v150_v1 = vld [vmem:[#allocation6] sm:$0xff]  ;;  %vm169_vm0 = vcmask 1040384   ;;  %vm127_vm1 = vcmask 1041408  }
   0xc   :  { %v48_v2 = vmax.f32 %v47_v0, 0.0  ;;  %v46_v27 = vld [vmem:[#allocation3] sm:$0xff]  ;;  %vm129_vm2 = vcmask 1045508   ;;  %vm131_vm3 = vcmask 1043456   ;;  %s298_s1 = smov [#allocation8]   ;;  %s200_s27 = sshll.u32 %s350_s3, 4  ;;  %s201_s27 = int_to_ptr.hbm [resolvable:$true] %s200_s27 }
   0xd   :  { %v68_v36 = vperm.slane %v46_v27, 1  ;;  %v69_v37 = vperm.slane %v46_v27, 2  ;;  %v67_v38 = vperm.slane %v46_v27, 0  ;;  %v70_v39 = vperm.slane %v46_v27, 3  ;;  %s198_s2 = sshll.u32 %s298_s1, 4  ;;  %s199_s2 = int_to_ptr.vmem [resolvable:$true] %s198_s2 }
   0xe   :  { %v151_v3 = vmul.f32 %v150_v1, %v48_v2  ;;  %v51_v28 = vperm.slane %v48_v2, 1  ;;  %v52_v29 = vperm.slane %v48_v2, 2  ;;  %v53_v30 = vperm.slane %v48_v2, 3 }
   0xf   :  { %v55_v31 = vperm.slane %v48_v2, 5  ;;  %v56_v32 = vperm.slane %v48_v2, 6  ;;  %v57_v33 = vperm.slane %v48_v2, 7  ;;  %v50_v34 = vperm.slane %v48_v2, 0 }
  0x10   :  { %v153_v4 = vperm.slane %v151_v3, 0  ;;  %v154_v5 = vperm.slane %v151_v3, 1  ;;  %v155_v6 = vperm.slane %v151_v3, 2  ;;  %v156_v7 = vperm.slane %v151_v3, 3 }
  0x11   :  { %v157_v8 = vperm.slane %v151_v3, 4  ;;  %v158_v13 = vperm.slane %v151_v3, 5  ;;  %v159_v16 = vperm.slane %v151_v3, 6  ;;  %v160_v19 = vperm.slane %v151_v3, 7 }
  0x12   :  { %v170_v9 = vsel %vm169_vm0, %v153_v4, 0.0  ;;  %v171_v10 = vsel %vm169_vm0, %v154_v5, 0.0  ;;  %v173_v11 = vsel %vm169_vm0, %v155_v6, 0.0  ;;  %v175_v14 = vsel %vm169_vm0, %v156_v7, 0.0 }
  0x13   :  { %v172_v12 = vadd.f32 %v171_v10, %v170_v9  ;;  %v177_v17 = vsel %vm169_vm0, %v157_v8, 0.0  ;;  %v179_v20 = vsel %vm169_vm0, %v158_v13, 0.0  ;;  %v181_v22 = vsel %vm169_vm0, %v159_v16, 0.0 }
  0x14   :  { %v183_v24 = vsel %vm169_vm0, %v160_v19, 0.0  ;;  %v54_v35 = vperm.slane %v48_v2, 4  ;;  %v71_v40 = vperm.slane %v46_v27, 4  ;;  %v72_v41 = vperm.slane %v46_v27, 5 }
  0x15   :  { %v174_v15 = vadd.f32 %v173_v11, %v172_v12  ;;  %v73_v42 = vperm.slane %v46_v27, 6  ;;  %v74_v43 = vperm.slane %v46_v27, 7  ;;  %v84_v44 = vperm.slane %v51_v28, 0 }
  0x16   :  { %v85_v45 = vperm.slane %v52_v29, 0  ;;  %v83_v46 = vperm.slane %v50_v34, 0  ;;  %v86_v47 = vperm.slane %v53_v30, 0  ;;  %v88_v48 = vperm.slane %v55_v31, 0 }
  0x17   :  { %v176_v18 = vadd.f32 %v175_v14, %v174_v15  ;;  %v89_v49 = vperm.slane %v56_v32, 0  ;;  %v87_v50 = vperm.slane %v54_v35, 0  ;;  %v90_v51 = vperm.slane %v57_v33, 0 }
  0x18   :  { %v92_v52 = vperm.slane %v68_v36, 0  ;;  %v93_v53 = vperm.slane %v69_v37, 0  ;;  %v91_v54 = vperm.slane %v67_v38, 0  ;;  %v94_v55 = vperm.slane %v70_v39, 0 }
  0x19   :  { %v178_v21 = vadd.f32 %v177_v17, %v176_v18  ;;  %v95_v56 = vperm.slane %v71_v40, 0  ;;  %v96_v57 = vperm.slane %v72_v41, 0  ;;  %v97_v58 = vperm.slane %v73_v42, 0 }
  0x1a   :  { %v98_v59 = vperm.slane %v74_v43, 0  ;;  %v115_v60 = vrot.slane %v84_v44, 6  ;;  %v116_v61 = vrot.slane %v85_v45, 4  ;;  %v117_v62 = vrot.slane %v86_v47, 2 }
  0x1b   :  { %v180_v23 = vadd.f32 %v179_v20, %v178_v21  ;;  %v118_v63 = vrot.slane %v88_v48, 6  ;;  %v119_v0 = vrot.slane %v89_v49, 4  ;;  %v120_v1 = vrot.slane %v90_v51, 2 }
  0x1c   :  { %v121_v2 = vrot.slane %v92_v52, 6  ;;  %v122_v3 = vrot.slane %v93_v53, 4  ;;  %v123_v4 = vrot.slane %v94_v55, 2  ;;  %v124_v5 = vrot.slane %v96_v57, 6 }
  0x1d   :  { %v182_v25 = vadd.f32 %v181_v22, %v180_v23  ;;  %v125_v6 = vrot.slane %v97_v58, 4  ;;  %v126_v7 = vrot.slane %v98_v59, 2  ;;  %v128_v8 = vsel %vm127_vm1, %v83_v46, %v115_v60 }
  0x1e   :  { %v130_v9 = vsel %vm129_vm2, %v116_v61, %v117_v62  ;;  %v133_v10 = vsel %vm127_vm1, %v87_v50, %v118_v63  ;;  %v134_v12 = vsel %vm129_vm2, %v119_v0, %v120_v1  ;;  %v136_v13 = vsel %vm127_vm1, %v91_v54, %v121_v2 }
  0x1f   :  { %v184_v26 = vadd.f32 %v183_v24, %v182_v25  ;;  %v132_v11 = vsel %vm131_vm3, %v128_v8, %v130_v9  ;;  %v137_v14 = vsel %vm129_vm2, %v122_v3, %v123_v4  ;;  %v135_v15 = vsel %vm131_vm3, %v133_v10, %v134_v12 }
  0x20   :  { %v138_v16 = vsel %vm131_vm3, %v136_v13, %v137_v14  ;;  %v139_v17 = vsel %vm127_vm1, %v95_v56, %v124_v5  ;;  %v140_v18 = vsel %vm129_vm2, %v125_v6, %v126_v7  ;;  %146 = vst [vmem:[#allocation8] sm:$0xff] %v132_v11  ;;  %v188_v20 = vstv %s347_s0 }
  0x21   :  { %185 = vadd.xlane.f32.xlu0 %v184_v26  ;;  %v141_v19 = vsel %vm131_vm3, %v139_v17, %v140_v18  ;;  %147 = vst [vmem:[#allocation8 + $0x8] sm:$0xff] %v135_v15  ;;  %vm191_vm4 = vcmask 1024  }
  0x22   :  { %148 = vst [vmem:[#allocation8 + $0x10] sm:$0xff] %v138_v16 }
  0x23   :  { %149 = vst [vmem:[#allocation8 + $0x18] sm:$0xff] %v141_v19 }
  0x24   :  { %203 = dma.vmem_to_hbm [thread:$0]  %s199_s2, 512, %s201_s27, [#allocation5]  }
  0x94   :  { %v186_v21 = vpop.xlane.xlu0 %185 }
  0x95   :  { %v189_v22 = vadd.f32 %v188_v20, %v186_v21 }
  0x97   :  { %v190_v23 = vperm.slane %v189_v22, 0 }
  0x99   :  { %192 = vst.msk [vmem:[%s351_s4] sm:$0x3] %vm191_vm4, %v190_v23 }
  0x9a   :  { %294 = dma.done.wait [#allocation5], 512  }
  0x9b   :  { %295 = vsyncadd [#allocation5], 4294966784 }
  0x9c   :  { %212 = vsyncpa [#allocation4], 1 }
  0x9d   :  { %213 = vsyncpa [#allocation7], 1 }
  0x9e   :  { %214 = vsyncpa [#allocation5], 1 }

</bundles_post_ra>
